<compile_context>
chip_gen: v7x
topology: tpu7x:2x2x1
jax: 0.10.0
libtpu: 0.0.40
codegen_flags: <defaults>
</compile_context>

<pallas_src>
import functools
import math

import jax
import jax.numpy as jnp
from jax import lax
from jax.experimental import pallas as pl
from jax.experimental.pallas import tpu as pltpu

_LANE = 128


def _round_up(a, b):
    return -(-a // b) * b


def _cdiv(a, b):
    return -(-a // b)


@functools.lru_cache(maxsize=None)
def _vmem_capacity_bytes():
    try:
        cap = int(pltpu.get_tpu_info().vmem_capacity_bytes)
        if cap >= (16 << 20):
            return cap
    except Exception:
        pass
    return 64 << 20  # v7x-safe fallback (64 MiB per TensorCore)


@functools.lru_cache(maxsize=None)
def _num_tensorcores():
    """Best-effort TensorCore count; defaults to 1 (v5e / v6e)."""
    try:
        info = pltpu.get_tpu_info()
        for name in ("num_cores", "core_count", "num_tensorcores",
                     "tensorcore_count"):
            v = getattr(info, name, None)
            if isinstance(v, int) and v > 0:
                return v
    except Exception:
        pass
    try:
        kind = jax.devices()[0].device_kind.lower()
        if "v7" in kind or "tpu7" in kind or "7x" in kind:
            return 2
    except Exception:
        pass
    return 1


def _cossim_partials_kernel(x_ref, out_ref, *, c_blk, tile_s, acc_w, nt, p,
                            valid_last, unroll):
    """Accumulate lane-parallel partials of dot / ||x0||^2 / ||x1||^2.

    x_ref  : (2, c_blk, tile_s) — both pair members, one channel block, one
             spatial tile (single DMA pipeline).
    out_ref: (3, c_blk, acc_w)  — resident across the spatial grid axis;
             [0]=dot, [1]=|x0|^2, [2]=|x1|^2 partial sums.
    """
    pi = pl.program_id(0)
    si = pl.program_id(2)

    @pl.when(si == 0)
    def _():
        out_ref[...] = jnp.zeros_like(out_ref)

    nchunks = tile_s // acc_w

    def _accumulate(valid):
        def body(j, carry):
            d, n0, n1 = carry
            off = pl.multiple_of(j * acc_w, acc_w)
            a = x_ref[0, :, pl.ds(off, acc_w)].astype(jnp.float32)
            b = x_ref[1, :, pl.ds(off, acc_w)].astype(jnp.float32)
            if valid is not None:
                lane = (jax.lax.broadcasted_iota(jnp.int32, (c_blk, acc_w), 1)
                        + j * acc_w)
                m = lane < valid
                a = jnp.where(m, a, 0.0)
                b = jnp.where(m, b, 0.0)
            return d + a * b, n0 + a * a, n1 + b * b

        z = jnp.zeros((c_blk, acc_w), jnp.float32)
        d, n0, n1 = lax.fori_loop(0, nchunks, body, (z, z, z),
                                  unroll=min(unroll, nchunks))
        out_ref[0] += d
        out_ref[1] += n0
        out_ref[2] += n1

    if valid_last is None:
        # All spatial tiles are fully in-bounds.
        _accumulate(None)
    else:
        # Only the last global spatial tile is ragged; mask only there.
        is_last = jnp.logical_and(pi == p - 1, si == nt - 1)

        @pl.when(jnp.logical_not(is_last))
        def _():
            _accumulate(None)

        @pl.when(is_last)
        def _():
            _accumulate(valid_last)


@functools.lru_cache(maxsize=None)
def _make_plan(c, s, itemsize):
    # Channel blocking: <=32 rows keeps the three (c_blk, 128) f32 vreg
    # accumulators at <=12 vregs so the hot loop never spills.
    c_blk = c if c <= 32 else 32
    num_cb = _cdiv(c, c_blk)

    cap = _vmem_capacity_bytes()
    # Budget for the double-buffered input stream; leave room for the merged
    # output buffers + compiler-internal scratch (matters on v7x's 64 MiB).
    input_budget = max(16 << 20, min(cap - (24 << 20), 96 << 20))

    bytes_per_lane = 2 * c_blk * itemsize  # both pair members
    if s < _LANE:
        tile_s = s          # single block == full array dim (legal, tiny)
        acc_w = s
    else:
        acc_w = _LANE
        tile_budget = (input_budget // (2 * bytes_per_lane)) // _LANE * _LANE
        tile_target = ((16 << 20) // bytes_per_lane) // _LANE * _LANE
        tile_cap = (s // _LANE) * _LANE   # block never exceeds the array dim
        tile_s = max(_LANE, min(tile_budget, tile_target, tile_cap))

    tiles_total = _cdiv(s, tile_s)

    # Spatial slab split across TensorCores: only on 2-TC parts (v7x) and only
    # when the tile count divides evenly (no fully out-of-range tiles).
    p = 1
    if _num_tensorcores() >= 2 and tiles_total >= 2:
        if tiles_total % 2 != 0:
            cand = max(_LANE, _round_up(_cdiv(s, tiles_total + 1), _LANE))
            if cand <= tile_s and _cdiv(s, cand) % 2 == 0:
                tile_s = cand
                tiles_total = _cdiv(s, cand)
        if tiles_total % 2 == 0:
            p = 2
    nt = tiles_total // p

    valid_last = s - (tiles_total - 1) * tile_s  # valid lanes in last tile
    if valid_last == tile_s:
        valid_last = None                        # fully aligned -> no masking

    inflight = 2 * (2 * c_blk * tile_s * itemsize)    # double-buffered input
    out_bufs = 2 * (3 * c_blk * acc_w * 4)
    vmem_limit = int(min(cap - (4 << 20),
                         max(32 << 20, inflight + out_bufs + (8 << 20))))

    return dict(c_blk=c_blk, num_cb=num_cb, tile_s=tile_s, acc_w=acc_w,
                nt=nt, p=p, valid_last=valid_last, vmem_limit=vmem_limit)


@functools.partial(
    jax.jit,
    static_argnames=("c_blk", "num_cb", "tile_s", "acc_w", "nt", "p",
                     "valid_last", "vmem_limit"))
def _loss_impl(x, label, *, c_blk, num_cb, tile_s, acc_w, nt, p, valid_last,
               vmem_limit):
    _, c, _ = x.shape
    rows = num_cb * c_blk

    kernel = functools.partial(
        _cossim_partials_kernel, c_blk=c_blk, tile_s=tile_s, acc_w=acc_w,
        nt=nt, p=p, valid_last=valid_last, unroll=8)

    partials = pl.pallas_call(
        kernel,
        out_shape=jax.ShapeDtypeStruct((p, 3, rows, acc_w), jnp.float32),
        grid=(p, num_cb, nt),
        in_specs=[pl.BlockSpec((2, c_blk, tile_s),
                               lambda pi, ci, si: (0, ci, pi * nt + si))],
        out_specs=pl.BlockSpec((pl.Squeezed(), 3, c_blk, acc_w),
                               lambda pi, ci, si: (pi, 0, ci, 0)),
        compiler_params=pltpu.CompilerParams(
            dimension_semantics=("parallel", "parallel", "arbitrary"),
            vmem_limit_bytes=vmem_limit),
    )(x)

    # Tiny epilogue: reduce over slabs + lanes, drop out-of-range channel rows.
    sums = partials.sum(axis=(0, 3))[:, :c]     # (3, C)
    dot, n0, n1 = sums[0], sums[1], sums[2]

    eps = jnp.float32(1e-8)  # F.cosine_similarity clamps each norm separately
    denom = jnp.maximum(jnp.sqrt(n0), eps) * jnp.maximum(jnp.sqrt(n1), eps)
    d = jnp.abs(dot / denom)                    # sqrt(square(cos)) == |cos|
    logd = jnp.log(d)
    # NOTE: forward-only semantics; both branches are evaluated before the
    # select (matches the PyTorch forward values; not meant for autodiff).
    return jnp.where(label[0] != label[1],
                     -jnp.mean(1.0 / logd), -jnp.mean(logd))


def cosine_similarity_loss(inp, label):
    """inp: (B, C, *spatial) as in the PyTorch module; label: (B,)."""
    if label.shape[0] != 2:
        return jnp.float32(0.0)                 # module returns 0 here
    b, c = inp.shape[0], inp.shape[1]
    s = int(math.prod(inp.shape[2:]))
    x = jnp.reshape(inp, (b, c, s))             # Flatten(2): no copy
    if b != 2:
        x = x[:2]
    plan = _make_plan(c, s, jnp.dtype(inp.dtype).itemsize)
    return _loss_impl(x, label, **plan)


def _reference_loss(inp, label):
    x = inp.reshape(inp.shape[0], inp.shape[1], -1).astype(jnp.float32)
    x0, x1 = x[0], x[1]
    dot = jnp.sum(x0 * x1, axis=-1)
    n0 = jnp.sqrt(jnp.sum(x0 * x0, axis=-1))
    n1 = jnp.sqrt(jnp.sum(x1 * x1, axis=-1))
    eps = jnp.float32(1e-8)
    d = jnp.abs(dot / (jnp.maximum(n0, eps) * jnp.maximum(n1, eps)))
    logd = jnp.log(d)
    return jnp.where(label[0] != label[1],
                     -jnp.mean(1.0 / logd), -jnp.mean(logd))


if __name__ == "__main__":
    key = jax.random.PRNGKey(0)
    label_diff = jnp.array([0, 1], dtype=jnp.int32)   # different-labels branch
    label_same = jnp.array([1, 1], dtype=jnp.int32)   # same-labels branch

    # Primary shape implied by the module: pair batch=2, C=4, 16x16 spatial.
    x = jax.random.normal(key, (2, 4, 16, 16), dtype=jnp.float32)
    loss_a = cosine_similarity_loss(x, label_diff)
    loss_b = cosine_similarity_loss(x, label_same)
    jax.block_until_ready((loss_a, loss_b))
    assert jnp.allclose(loss_a, _reference_loss(x, label_diff),
                        rtol=5e-4, atol=1e-5), (loss_a, _reference_loss(x, label_diff))
    assert jnp.allclose(loss_b, _reference_loss(x, label_same),
                        rtol=5e-4, atol=1e-5), (loss_b, _reference_loss(x, label_same))

    # Non-128-aligned spatial / channel sizes exercise the in-kernel ragged
    # masking and partial channel blocks (no host-side padding copies).
    for shape in ((2, 3, 10, 10), (2, 5, 12, 15), (2, 40, 17, 23)):
        xi = jax.random.normal(jax.random.fold_in(key, shape[1]), shape,
                               dtype=jnp.float32)
        got = cosine_similarity_loss(xi, label_diff)
        want = _reference_loss(xi, label_diff)
        jax.block_until_ready(got)
        assert jnp.allclose(got, want, rtol=5e-4, atol=1e-5), (shape, got, want)

    print("KERNEL_OK")
</pallas_src>

<mosaic_0001>
module attributes {stable_mosaic.version = 11 : i64} {
  func.func @_cossim_partials_kernel(%arg0: i32, %arg1: i32, %arg2: i32, %arg3: memref<2x4x256xf32, #tpu.memory_space<vmem>>, %arg4: memref<1x3x4x128xf32, #tpu.memory_space<vmem>>) attributes {dimension_semantics = [#tpu.dimension_semantics<parallel>, #tpu.dimension_semantics<parallel>, #tpu.dimension_semantics<arbitrary>], iteration_bounds = array<i64: 1, 1, 1>, scalar_prefetch = 0 : i64, scratch_operands = 0 : i64, tpu.core_type = #tpu.core_type<tc>, window_params = [{transform_indices = @transform_0, window_bounds = array<i64: 2, 4, 256>}, {transform_indices = @transform_1, window_bounds = array<i64: 1, 3, 4, 128>}]} {
    %c0_i32 = arith.constant 0 : i32
    %0 = arith.cmpi eq, %arg2, %c0_i32 : i32
    %1 = arith.extui %0 : i1 to i32
    %c0_i32_0 = arith.constant 0 : i32
    %2 = arith.cmpi ne, %1, %c0_i32_0 : i32
    scf.if %2 {
      %cst_32 = arith.constant 0.000000e+00 : f32
      %50 = vector.broadcast %cst_32 : f32 to vector<3x4x128xf32>
      %c0_33 = arith.constant 0 : index
      %c0_34 = arith.constant 0 : index
      %c0_35 = arith.constant 0 : index
      %c0_36 = arith.constant 0 : index
      %51 = vector.load %arg4[%c0_33, %c0_34, %c0_35, %c0_36] : memref<1x3x4x128xf32, #tpu.memory_space<vmem>>, vector<1x3x4x128xf32>
      %52 = vector.shape_cast %51 : vector<1x3x4x128xf32> to vector<3x4x128xf32>
      %53 = vector.shape_cast %50 : vector<3x4x128xf32> to vector<1x3x4x128xf32>
      tpu.vector_store %arg4[%c0_33, %c0_34, %c0_35, %c0_36], %53 {strides = array<i32>} : memref<1x3x4x128xf32, #tpu.memory_space<vmem>>, vector<1x3x4x128xf32>,
    } else {
    }
    %cst = arith.constant 0.000000e+00 : f32
    %3 = vector.broadcast %cst : f32 to vector<4x128xf32>
    %c0_i32_1 = arith.constant 0 : i32
    %c128_i32 = arith.constant 128 : i32
    %4 = arith.muli %c0_i32_1, %c128_i32 : i32
    %5 = tpu.assume_multiple %4, 128 : i32
    %c0 = arith.constant 0 : index
    %c0_2 = arith.constant 0 : index
    %6 = arith.index_cast %5 : i32 to index
    %7 = vector.load %arg3[%c0, %c0_2, %6] : memref<2x4x256xf32, #tpu.memory_space<vmem>>, vector<1x4x128xf32>
    %8 = vector.shape_cast %7 : vector<1x4x128xf32> to vector<4x128xf32>
    %c1 = arith.constant 1 : index
    %c0_3 = arith.constant 0 : index
    %9 = arith.index_cast %5 : i32 to index
    %10 = vector.load %arg3[%c1, %c0_3, %9] : memref<2x4x256xf32, #tpu.memory_space<vmem>>, vector<1x4x128xf32>
    %11 = vector.shape_cast %10 : vector<1x4x128xf32> to vector<4x128xf32>
    %12 = arith.mulf %8, %11 : vector<4x128xf32>
    %13 = arith.addf %3, %12 : vector<4x128xf32>
    %14 = arith.mulf %8, %8 : vector<4x128xf32>
    %15 = arith.addf %3, %14 : vector<4x128xf32>
    %16 = arith.mulf %11, %11 : vector<4x128xf32>
    %17 = arith.addf %3, %16 : vector<4x128xf32>
    %c1_i32 = arith.constant 1 : i32
    %c128_i32_4 = arith.constant 128 : i32
    %18 = arith.muli %c1_i32, %c128_i32_4 : i32
    %19 = tpu.assume_multiple %18, 128 : i32
    %c0_5 = arith.constant 0 : index
    %c0_6 = arith.constant 0 : index
    %20 = arith.index_cast %19 : i32 to index
    %21 = vector.load %arg3[%c0_5, %c0_6, %20] : memref<2x4x256xf32, #tpu.memory_space<vmem>>, vector<1x4x128xf32>
    %22 = vector.shape_cast %21 : vector<1x4x128xf32> to vector<4x128xf32>
    %c1_7 = arith.constant 1 : index
    %c0_8 = arith.constant 0 : index
    %23 = arith.index_cast %19 : i32 to index
    %24 = vector.load %arg3[%c1_7, %c0_8, %23] : memref<2x4x256xf32, #tpu.memory_space<vmem>>, vector<1x4x128xf32>
    %25 = vector.shape_cast %24 : vector<1x4x128xf32> to vector<4x128xf32>
    %26 = arith.mulf %22, %25 : vector<4x128xf32>
    %27 = arith.addf %13, %26 : vector<4x128xf32>
    %28 = arith.mulf %22, %22 : vector<4x128xf32>
    %29 = arith.addf %15, %28 : vector<4x128xf32>
    %30 = arith.mulf %25, %25 : vector<4x128xf32>
    %31 = arith.addf %17, %30 : vector<4x128xf32>
    %c2_i32 = arith.constant 2 : i32
    %c0_9 = arith.constant 0 : index
    %c0_10 = arith.constant 0 : index
    %c0_11 = arith.constant 0 : index
    %c0_12 = arith.constant 0 : index
    %32 = vector.load %arg4[%c0_9, %c0_10, %c0_11, %c0_12] : memref<1x3x4x128xf32, #tpu.memory_space<vmem>>, vector<1x1x4x128xf32>
    %33 = vector.shape_cast %32 : vector<1x1x4x128xf32> to vector<4x128xf32>
    %34 = arith.addf %33, %27 : vector<4x128xf32>
    %c0_13 = arith.constant 0 : index
    %c0_14 = arith.constant 0 : index
    %c0_15 = arith.constant 0 : index
    %c0_16 = arith.constant 0 : index
    %35 = vector.load %arg4[%c0_13, %c0_14, %c0_15, %c0_16] : memref<1x3x4x128xf32, #tpu.memory_space<vmem>>, vector<1x1x4x128xf32>
    %36 = vector.shape_cast %35 : vector<1x1x4x128xf32> to vector<4x128xf32>
    %37 = vector.shape_cast %34 : vector<4x128xf32> to vector<1x1x4x128xf32>
    tpu.vector_store %arg4[%c0_13, %c0_14, %c0_15, %c0_16], %37 {strides = array<i32>} : memref<1x3x4x128xf32, #tpu.memory_space<vmem>>, vector<1x1x4x128xf32>,
    %c0_17 = arith.constant 0 : index
    %c1_18 = arith.constant 1 : index
    %c0_19 = arith.constant 0 : index
    %c0_20 = arith.constant 0 : index
    %38 = vector.load %arg4[%c0_17, %c1_18, %c0_19, %c0_20] : memref<1x3x4x128xf32, #tpu.memory_space<vmem>>, vector<1x1x4x128xf32>
    %39 = vector.shape_cast %38 : vector<1x1x4x128xf32> to vector<4x128xf32>
    %40 = arith.addf %39, %29 : vector<4x128xf32>
    %c0_21 = arith.constant 0 : index
    %c1_22 = arith.constant 1 : index
    %c0_23 = arith.constant 0 : index
    %c0_24 = arith.constant 0 : index
    %41 = vector.load %arg4[%c0_21, %c1_22, %c0_23, %c0_24] : memref<1x3x4x128xf32, #tpu.memory_space<vmem>>, vector<1x1x4x128xf32>
    %42 = vector.shape_cast %41 : vector<1x1x4x128xf32> to vector<4x128xf32>
    %43 = vector.shape_cast %40 : vector<4x128xf32> to vector<1x1x4x128xf32>
    tpu.vector_store %arg4[%c0_21, %c1_22, %c0_23, %c0_24], %43 {strides = array<i32>} : memref<1x3x4x128xf32, #tpu.memory_space<vmem>>, vector<1x1x4x128xf32>,
    %c0_25 = arith.constant 0 : index
    %c2 = arith.constant 2 : index
    %c0_26 = arith.constant 0 : index
    %c0_27 = arith.constant 0 : index
    %44 = vector.load %arg4[%c0_25, %c2, %c0_26, %c0_27] : memref<1x3x4x128xf32, #tpu.memory_space<vmem>>, vector<1x1x4x128xf32>
    %45 = vector.shape_cast %44 : vector<1x1x4x128xf32> to vector<4x128xf32>
    %46 = arith.addf %45, %31 : vector<4x128xf32>
    %c0_28 = arith.constant 0 : index
    %c2_29 = arith.constant 2 : index
    %c0_30 = arith.constant 0 : index
    %c0_31 = arith.constant 0 : index
    %47 = vector.load %arg4[%c0_28, %c2_29, %c0_30, %c0_31] : memref<1x3x4x128xf32, #tpu.memory_space<vmem>>, vector<1x1x4x128xf32>
    %48 = vector.shape_cast %47 : vector<1x1x4x128xf32> to vector<4x128xf32>
    %49 = vector.shape_cast %46 : vector<4x128xf32> to vector<1x1x4x128xf32>
    tpu.vector_store %arg4[%c0_28, %c2_29, %c0_30, %c0_31], %49 {strides = array<i32>} : memref<1x3x4x128xf32, #tpu.memory_space<vmem>>, vector<1x1x4x128xf32>,
    return
  }
  func.func @transform_0(%arg0: i32, %arg1: i32, %arg2: i32) -> (i32, i32, i32) {
    %c1_i32 = arith.constant 1 : i32
    %0 = arith.muli %arg0, %c1_i32 : i32
    %1 = arith.addi %0, %arg2 : i32
    %c0_i32 = arith.constant 0 : i32
    %c0_i32_0 = arith.constant 0 : i32
    return %c0_i32, %arg1, %1 : i32, i32, i32
  }
  func.func @transform_1(%arg0: i32, %arg1: i32, %arg2: i32) -> (i32, i32, i32, i32) {
    %c0_i32 = arith.constant 0 : i32
    %c0_i32_0 = arith.constant 0 : i32
    %c0_i32_1 = arith.constant 0 : i32
    return %arg0, %c0_i32, %arg1, %c0_i32_0 : i32, i32, i32, i32
  }
}

</mosaic_0001>

<bundles_post_ra>
// kernel: _loss_impl.1
= control target key start
LH: loop header
LB: loop body
LE: loop exit
PB: predicated region body
PF: predicated region fallthrough
CT: control target
= control target key end

     0   :  { %v91_v0 = vmov 0.0   ;;  %s141_s1 = inlined_call_operand.vmem [shape: f32[1,3,4,128], index: 1, kind: output, shape index: {}]   ;;  %s142_s0 = inlined_call_operand.vmem [shape: f32[2,4,256], index: 0, kind: input, shape index: {}]  }
   0x1   :  { %34 = vst [vmem:[%s141_s1] sm:$0xf] %v91_v0  ;;  %35 = vst [vmem:[%s141_s1 + $0x4] sm:$0xf] %v91_v0  ;;  %v37_v1 = vld [vmem:[%s142_s0] sm:$0xf] }
   0x2   :  { %36 = vst [vmem:[%s141_s1 + $0x8] sm:$0xf] %v91_v0  ;;  %v83_v2 = vld [vmem:[%s142_s0 + $0x8] sm:$0xf]  ;;  %v84_v3 = vld [vmem:[%s142_s0 + $0x4] sm:$0xf]  ;;  %v44_v6 = vmul.f32 %v37_v1, %v37_v1 }
   0x3   :  { %v42_v4 = vmul.f32 %v83_v2, %v37_v1  ;;  %v85_v5 = vld [vmem:[%s142_s0 + $0xc] sm:$0xf]  ;;  %v56_v7 = vmul.f32 %v84_v3, %v84_v3  ;;  %v46_v8 = vmul.f32 %v83_v2, %v83_v2 }
   0x4   :  { %v54_v9 = vmul.f32 %v85_v5, %v84_v3  ;;  %v58_v10 = vmul.f32 %v85_v5, %v85_v5 }
   0x5   :  { %v57_v12 = vadd.f32 %v56_v7, %v44_v6 }
   0x6   :  { %v55_v11 = vadd.f32 %v54_v9, %v42_v4  ;;  %v59_v13 = vadd.f32 %v58_v10, %v46_v8 }
   0x8   :  { %v60_v14 = vld [vmem:[%s141_s1] sm:$0xf]  ;;  %v86_v15 = vld [vmem:[%s141_s1 + $0x4] sm:$0xf] }
   0x9   :  { %v88_v16 = vld [vmem:[%s141_s1 + $0x8] sm:$0xf]  ;;  %v61_v17 = vadd.f32 %v60_v14, %v55_v11  ;;  %v65_v18 = vadd.f32 %v86_v15, %v57_v12 }
   0xa   :  { %v69_v19 = vadd.f32 %v88_v16, %v59_v13 }
   0xb   :  { %62 = vst [vmem:[%s141_s1] sm:$0xf] %v61_v17  ;;  %87 = vst [vmem:[%s141_s1 + $0x4] sm:$0xf] %v65_v18 }
   0xc   :  { %89 = vst [vmem:[%s141_s1 + $0x8] sm:$0xf] %v69_v19 }

</bundles_post_ra>
